<compile_context>
chip_gen: v7x
topology: tpu7x:2x2x1
jax: 0.10.0
libtpu: 0.0.40
codegen_flags: <defaults>
</compile_context>

<pallas_src>
import functools

import jax
import jax.numpy as jnp
from jax.experimental import pallas as pl
from jax.experimental.pallas import tpu as pltpu


def _siamese_kernel(idx_ref, w_ref, b_ref, o_ref, *,
                    alphabet_size, kernel_size, l_out):
    """idx_ref: (2, S, TB) int32 (branch, time, batch-on-lanes);
    w_ref: (C, K*A) f32 folded embed+conv weight; b_ref: (C, 1) f32;
    o_ref: (1, TB) f32 (lane-dense cosine output)."""
    _, seq, tb = idx_ref.shape
    a = alphabet_size
    kk = kernel_size
    n = 2 * tb                                                    # both branches

    # Stack the two siamese branches along the lane (batch) axis.
    idx = jnp.concatenate([idx_ref[0], idx_ref[1]], axis=-1)      # (S, N) int32

    # Per-time-step one-hot rows over the alphabet, batch on lanes.
    # Each compare is a dense (A, N) vreg op; out-of-range index -> all-zero row.
    iota_a = jax.lax.broadcasted_iota(jnp.int32, (a, n), 0)       # (A, N)
    oh = [(idx[s:s + 1, :] == iota_a).astype(jnp.float32) for s in range(seq)]

    w = w_ref[...]                                                # (C, K*A)

    # Valid Conv1d with the embedding folded in: one matmul per output position,
    # global max-pool as a running elementwise max (no reshape, no transpose).
    pooled = None
    for t in range(l_out):
        oh_t = jnp.concatenate([oh[t + k] for k in range(kk)], axis=0)   # (K*A, N)
        conv_t = jnp.dot(w, oh_t, preferred_element_type=jnp.float32)    # (C, N)
        pooled = conv_t if t == 0 else jnp.maximum(pooled, conv_t)

    feat = pooled + b_ref[...]                                    # (C, N), post-pool bias

    # CosineSimilarity(dim=1, eps=1e-6); batch stays on the lane axis.
    f1 = feat[:, :tb]                                             # (C, TB)
    f2 = feat[:, tb:]                                             # (C, TB)
    dot = jnp.sum(f1 * f2, axis=0, keepdims=True)                 # (1, TB)
    n1sq = jnp.sum(f1 * f1, axis=0, keepdims=True)
    n2sq = jnp.sum(f2 * f2, axis=0, keepdims=True)
    eps = jnp.float32(1e-6)
    inv = jax.lax.rsqrt(jnp.maximum(n1sq * n2sq, eps * eps))      # EUP rsqrt
    o_ref[...] = dot * inv                                        # lane-dense store


def _round_up(x, m):
    return ((x + m - 1) // m) * m


def siamese_forward(x1_idx, x2_idx, char2vect, conv_w, conv_b):
    """x*_idx: (B, S) int32 alphabet indices.
    char2vect: (A, E); conv_w: (C, E, K) (PyTorch layout); conv_b: (C,)."""
    B, S = x1_idx.shape
    C, E, K = conv_w.shape
    A = char2vect.shape[0]
    L = S - K + 1

    # ---- Host-side (constant-foldable) weight prep --------------------------
    # Fold the char embedding into the conv weight:
    #   w_eff[c, k*A + a] = sum_e emb[a, e] * conv_w[c, e, k]
    emb = char2vect.astype(jnp.float32)
    w_eff = jnp.einsum("ae,cek->cka", emb, conv_w.astype(jnp.float32))
    w_eff = w_eff.reshape(C, K * A)
    b = conv_b.reshape(C, 1).astype(jnp.float32)

    # ---- Batch tiling: batch sits on the lane axis -> tiles are k*128 -------
    lane = 128
    b128 = -(-B // lane)                  # batch size in lane-groups
    if b128 <= 1:
        tb_groups = 1                     # one 128-wide tile (can't split lanes)
    elif b128 <= 8:
        tb_groups = (b128 + 1) // 2       # >= 2 grid steps -> v7x megacore split
    else:
        tb_groups = 4                     # 512-lane tiles, grid amortizes overhead
    tb = tb_groups * lane
    B_pad = _round_up(B, tb)
    grid = (B_pad // tb,)

    # ---- Index prep: one stacked array, batch on lanes ----------------------
    idx = jnp.stack([x1_idx, x2_idx], axis=0).astype(jnp.int32)   # (2, B, S)
    if B_pad != B:
        idx = jnp.pad(idx, ((0, 0), (0, B_pad - B), (0, 0)))      # pad with index 0
    idx = jnp.transpose(idx, (0, 2, 1))                           # (2, S, B_pad)

    kernel = functools.partial(_siamese_kernel, alphabet_size=A,
                               kernel_size=K, l_out=L)

    cost = pl.CostEstimate(
        flops=2 * (2 * B_pad) * L * (K * A) * C,
        transcendentals=B_pad,
        bytes_accessed=idx.size * 4 + w_eff.size * 4 + b.size * 4 + B_pad * 4,
    )

    out = pl.pallas_call(
        kernel,
        grid=grid,
        in_specs=[
            pl.BlockSpec((2, S, tb), lambda i: (0, 0, i)),    # stacked int32 indices
            pl.BlockSpec((C, K * A), lambda i: (0, 0)),       # folded embed+conv weight
            pl.BlockSpec((C, 1), lambda i: (0, 0)),           # conv bias (post-pool)
        ],
        out_specs=pl.BlockSpec((1, tb), lambda i: (0, i)),    # lane-dense (1, B_pad)
        out_shape=jax.ShapeDtypeStruct((1, B_pad), jnp.float32),
        compiler_params=pltpu.CompilerParams(
            dimension_semantics=("parallel",)),               # shards TCs on v7x
        cost_estimate=cost,
    )(idx, w_eff, b)

    # PyTorch CosineSimilarity(dim=1) on (B, C, 1) features returns (B, 1).
    return out[0, :B].reshape(B, 1)


if __name__ == "__main__":
    key = jax.random.PRNGKey(0)
    alphabet = "abcdefghijklmnop"          # len(alphabet) = 16
    A = len(alphabet)
    emb_size, nb_conv, kernel_size = 8, 16, 3
    B, S = 2, 8                            # batch of 2 "strings" of length 8
    l_out = S - kernel_size + 1

    k1, k2, k3, k4, k5 = jax.random.split(key, 5)
    # char2vect ~ U(-1, 1), like np.random.uniform in __init__
    char2vect = jax.random.uniform(k1, (A, emb_size), jnp.float32, -1.0, 1.0)
    # Conv1d params, deterministic uniform init (PyTorch-style bound)
    bound = float(1.0 / (emb_size * kernel_size) ** 0.5)
    conv_w = jax.random.uniform(
        k2, (nb_conv, emb_size, kernel_size), jnp.float32, -bound, bound)
    conv_b = jax.random.uniform(k3, (nb_conv,), jnp.float32, -bound, bound)

    # Synthetic "strings": indices into the alphabet.
    x1_idx = jax.random.randint(k4, (B, S), 0, A, jnp.int32)
    x2_idx = jax.random.randint(k5, (B, S), 0, A, jnp.int32)

    out = siamese_forward(x1_idx, x2_idx, char2vect, conv_w, conv_b)
    jax.block_until_ready(out)
    assert out.shape == (B, 1) and out.dtype == jnp.float32

    # Pure-JAX reference (mirrors the PyTorch math) for a sanity check.
    def _reference(i1, i2):
        def once(idx):
            x = jnp.take(char2vect, idx, axis=0)                       # (B, S, E)
            conv = sum(
                jnp.einsum("ble,ce->blc", x[:, k:k + l_out, :], conv_w[:, :, k])
                for k in range(kernel_size)) + conv_b[None, None, :]   # (B, L, C)
            return jnp.max(conv, axis=1)                               # (B, C)
        f1, f2 = once(i1), once(i2)
        num = jnp.sum(f1 * f2, axis=-1)
        den = jnp.maximum(
            jnp.sqrt(jnp.sum(f1 * f1, -1)) * jnp.sqrt(jnp.sum(f2 * f2, -1)), 1e-6)
        return (num / den).reshape(-1, 1)

    ref = _reference(x1_idx, x2_idx)
    assert bool(jnp.allclose(out, ref, atol=2e-3, rtol=2e-3)), (out, ref)
    print("KERNEL_OK")
</pallas_src>

<mosaic_0001>
module attributes {stable_mosaic.version = 11 : i64} {
  func.func @_siamese_kernel(%arg0: i32, %arg1: memref<2x8x128xi32, #tpu.memory_space<vmem>>, %arg2: memref<16x48xf32, #tpu.memory_space<vmem>>, %arg3: memref<16x1xf32, #tpu.memory_space<vmem>>, %arg4: memref<1x128xf32, #tpu.memory_space<vmem>>) attributes {dimension_semantics = [#tpu.dimension_semantics<parallel>], iteration_bounds = array<i64: 1>, scalar_prefetch = 0 : i64, scratch_operands = 0 : i64, tpu.core_type = #tpu.core_type<tc>, window_params = [{transform_indices = @transform_0, window_bounds = array<i64: 2, 8, 128>}, {pipeline_mode = #tpu.pipeline_mode<synchronous>, transform_indices = @transform_1, window_bounds = array<i64: 16, 48>}, {pipeline_mode = #tpu.pipeline_mode<synchronous>, transform_indices = @transform_2, window_bounds = array<i64: 16, 1>}, {transform_indices = @transform_3, window_bounds = array<i64: 1, 128>}]} {
    %c0 = arith.constant 0 : index
    %c0_0 = arith.constant 0 : index
    %c0_1 = arith.constant 0 : index
    %0 = vector.load %arg1[%c0, %c0_0, %c0_1] : memref<2x8x128xi32, #tpu.memory_space<vmem>>, vector<1x8x128xi32>
    %1 = vector.shape_cast %0 : vector<1x8x128xi32> to vector<8x128xi32>
    %c1 = arith.constant 1 : index
    %c0_2 = arith.constant 0 : index
    %c0_3 = arith.constant 0 : index
    %2 = vector.load %arg1[%c1, %c0_2, %c0_3] : memref<2x8x128xi32, #tpu.memory_space<vmem>>, vector<1x8x128xi32>
    %3 = vector.shape_cast %2 : vector<1x8x128xi32> to vector<8x128xi32>
    %4 = tpu.concatenate %1, %3 in 1 : vector<8x128xi32>, vector<8x128xi32> -> vector<8x256xi32>
    %5 = tpu.iota {dimensions = array<i32: 0>} : vector<16x256xi32>
    %6 = vector.extract_strided_slice %4 {offsets = [0, 0], sizes = [1, 256], strides = [1, 1]} : vector<8x256xi32> to vector<1x256xi32>
    %7 = vector.broadcast %6 : vector<1x256xi32> to vector<16x256xi32>
    %8 = arith.cmpi eq, %7, %5 : vector<16x256xi32>
    %9 = arith.extui %8 : vector<16x256xi1> to vector<16x256xi32>
    %10 = arith.sitofp %9 : vector<16x256xi32> to vector<16x256xf32>
    %11 = vector.extract_strided_slice %4 {offsets = [1, 0], sizes = [1, 256], strides = [1, 1]} : vector<8x256xi32> to vector<1x256xi32>
    %12 = vector.broadcast %11 : vector<1x256xi32> to vector<16x256xi32>
    %13 = arith.cmpi eq, %12, %5 : vector<16x256xi32>
    %14 = arith.extui %13 : vector<16x256xi1> to vector<16x256xi32>
    %15 = arith.sitofp %14 : vector<16x256xi32> to vector<16x256xf32>
    %16 = vector.extract_strided_slice %4 {offsets = [2, 0], sizes = [1, 256], strides = [1, 1]} : vector<8x256xi32> to vector<1x256xi32>
    %17 = vector.broadcast %16 : vector<1x256xi32> to vector<16x256xi32>
    %18 = arith.cmpi eq, %17, %5 : vector<16x256xi32>
    %19 = arith.extui %18 : vector<16x256xi1> to vector<16x256xi32>
    %20 = arith.sitofp %19 : vector<16x256xi32> to vector<16x256xf32>
    %21 = vector.extract_strided_slice %4 {offsets = [3, 0], sizes = [1, 256], strides = [1, 1]} : vector<8x256xi32> to vector<1x256xi32>
    %22 = vector.broadcast %21 : vector<1x256xi32> to vector<16x256xi32>
    %23 = arith.cmpi eq, %22, %5 : vector<16x256xi32>
    %24 = arith.extui %23 : vector<16x256xi1> to vector<16x256xi32>
    %25 = arith.sitofp %24 : vector<16x256xi32> to vector<16x256xf32>
    %26 = vector.extract_strided_slice %4 {offsets = [4, 0], sizes = [1, 256], strides = [1, 1]} : vector<8x256xi32> to vector<1x256xi32>
    %27 = vector.broadcast %26 : vector<1x256xi32> to vector<16x256xi32>
    %28 = arith.cmpi eq, %27, %5 : vector<16x256xi32>
    %29 = arith.extui %28 : vector<16x256xi1> to vector<16x256xi32>
    %30 = arith.sitofp %29 : vector<16x256xi32> to vector<16x256xf32>
    %31 = vector.extract_strided_slice %4 {offsets = [5, 0], sizes = [1, 256], strides = [1, 1]} : vector<8x256xi32> to vector<1x256xi32>
    %32 = vector.broadcast %31 : vector<1x256xi32> to vector<16x256xi32>
    %33 = arith.cmpi eq, %32, %5 : vector<16x256xi32>
    %34 = arith.extui %33 : vector<16x256xi1> to vector<16x256xi32>
    %35 = arith.sitofp %34 : vector<16x256xi32> to vector<16x256xf32>
    %36 = vector.extract_strided_slice %4 {offsets = [6, 0], sizes = [1, 256], strides = [1, 1]} : vector<8x256xi32> to vector<1x256xi32>
    %37 = vector.broadcast %36 : vector<1x256xi32> to vector<16x256xi32>
    %38 = arith.cmpi eq, %37, %5 : vector<16x256xi32>
    %39 = arith.extui %38 : vector<16x256xi1> to vector<16x256xi32>
    %40 = arith.sitofp %39 : vector<16x256xi32> to vector<16x256xf32>
    %41 = vector.extract_strided_slice %4 {offsets = [7, 0], sizes = [1, 256], strides = [1, 1]} : vector<8x256xi32> to vector<1x256xi32>
    %42 = vector.broadcast %41 : vector<1x256xi32> to vector<16x256xi32>
    %43 = arith.cmpi eq, %42, %5 : vector<16x256xi32>
    %44 = arith.extui %43 : vector<16x256xi1> to vector<16x256xi32>
    %45 = arith.sitofp %44 : vector<16x256xi32> to vector<16x256xf32>
    %c0_4 = arith.constant 0 : index
    %c0_5 = arith.constant 0 : index
    %46 = vector.load %arg2[%c0_4, %c0_5] : memref<16x48xf32, #tpu.memory_space<vmem>>, vector<16x48xf32>
    %47 = tpu.concatenate %10, %15, %20 in 0 : vector<16x256xf32>, vector<16x256xf32>, vector<16x256xf32> -> vector<48x256xf32>
    %cst = arith.constant dense<0.000000e+00> : vector<16x256xf32>
    %48 = tpu.matmul %46, %47, %cst {dimension_numbers = #tpu.dot_dimension_numbers<[1], [0], [0], [1], [0, 0, 1, 1], [], []>} : vector<16x48xf32>, vector<48x256xf32>, vector<16x256xf32> -> vector<16x256xf32>
    %49 = tpu.concatenate %15, %20, %25 in 0 : vector<16x256xf32>, vector<16x256xf32>, vector<16x256xf32> -> vector<48x256xf32>
    %cst_6 = arith.constant dense<0.000000e+00> : vector<16x256xf32>
    %50 = tpu.matmul %46, %49, %cst_6 {dimension_numbers = #tpu.dot_dimension_numbers<[1], [0], [0], [1], [0, 0, 1, 1], [], []>} : vector<16x48xf32>, vector<48x256xf32>, vector<16x256xf32> -> vector<16x256xf32>
    %51 = arith.maximumf %48, %50 : vector<16x256xf32>
    %52 = tpu.concatenate %20, %25, %30 in 0 : vector<16x256xf32>, vector<16x256xf32>, vector<16x256xf32> -> vector<48x256xf32>
    %cst_7 = arith.constant dense<0.000000e+00> : vector<16x256xf32>
    %53 = tpu.matmul %46, %52, %cst_7 {dimension_numbers = #tpu.dot_dimension_numbers<[1], [0], [0], [1], [0, 0, 1, 1], [], []>} : vector<16x48xf32>, vector<48x256xf32>, vector<16x256xf32> -> vector<16x256xf32>
    %54 = arith.maximumf %51, %53 : vector<16x256xf32>
    %55 = tpu.concatenate %25, %30, %35 in 0 : vector<16x256xf32>, vector<16x256xf32>, vector<16x256xf32> -> vector<48x256xf32>
    %cst_8 = arith.constant dense<0.000000e+00> : vector<16x256xf32>
    %56 = tpu.matmul %46, %55, %cst_8 {dimension_numbers = #tpu.dot_dimension_numbers<[1], [0], [0], [1], [0, 0, 1, 1], [], []>} : vector<16x48xf32>, vector<48x256xf32>, vector<16x256xf32> -> vector<16x256xf32>
    %57 = arith.maximumf %54, %56 : vector<16x256xf32>
    %58 = tpu.concatenate %30, %35, %40 in 0 : vector<16x256xf32>, vector<16x256xf32>, vector<16x256xf32> -> vector<48x256xf32>
    %cst_9 = arith.constant dense<0.000000e+00> : vector<16x256xf32>
    %59 = tpu.matmul %46, %58, %cst_9 {dimension_numbers = #tpu.dot_dimension_numbers<[1], [0], [0], [1], [0, 0, 1, 1], [], []>} : vector<16x48xf32>, vector<48x256xf32>, vector<16x256xf32> -> vector<16x256xf32>
    %60 = arith.maximumf %57, %59 : vector<16x256xf32>
    %61 = tpu.concatenate %35, %40, %45 in 0 : vector<16x256xf32>, vector<16x256xf32>, vector<16x256xf32> -> vector<48x256xf32>
    %cst_10 = arith.constant dense<0.000000e+00> : vector<16x256xf32>
    %62 = tpu.matmul %46, %61, %cst_10 {dimension_numbers = #tpu.dot_dimension_numbers<[1], [0], [0], [1], [0, 0, 1, 1], [], []>} : vector<16x48xf32>, vector<48x256xf32>, vector<16x256xf32> -> vector<16x256xf32>
    %63 = arith.maximumf %60, %62 : vector<16x256xf32>
    %c0_11 = arith.constant 0 : index
    %c0_12 = arith.constant 0 : index
    %64 = vector.load %arg3[%c0_11, %c0_12] : memref<16x1xf32, #tpu.memory_space<vmem>>, vector<16x1xf32>
    %65 = vector.broadcast %64 : vector<16x1xf32> to vector<16x256xf32>
    %66 = arith.addf %63, %65 : vector<16x256xf32>
    %67 = vector.extract_strided_slice %66 {offsets = [0, 0], sizes = [16, 128], strides = [1, 1]} : vector<16x256xf32> to vector<16x128xf32>
    %68 = vector.extract_strided_slice %66 {offsets = [0, 128], sizes = [16, 128], strides = [1, 1]} : vector<16x256xf32> to vector<16x128xf32>
    %69 = arith.mulf %67, %68 : vector<16x128xf32>
    %cst_13 = arith.constant dense<0.000000e+00> : vector<128xf32>
    %70 = vector.multi_reduction <add>, %69, %cst_13 [0] : vector<16x128xf32> to vector<128xf32>
    %71 = vector.shape_cast %70 : vector<128xf32> to vector<1x128xf32>
    %72 = arith.mulf %67, %67 : vector<16x128xf32>
    %cst_14 = arith.constant dense<0.000000e+00> : vector<128xf32>
    %73 = vector.multi_reduction <add>, %72, %cst_14 [0] : vector<16x128xf32> to vector<128xf32>
    %74 = vector.shape_cast %73 : vector<128xf32> to vector<1x128xf32>
    %75 = arith.mulf %68, %68 : vector<16x128xf32>
    %cst_15 = arith.constant dense<0.000000e+00> : vector<128xf32>
    %76 = vector.multi_reduction <add>, %75, %cst_15 [0] : vector<16x128xf32> to vector<128xf32>
    %77 = vector.shape_cast %76 : vector<128xf32> to vector<1x128xf32>
    %78 = arith.mulf %74, %77 : vector<1x128xf32>
    %cst_16 = arith.constant 9.99999997E-7 : f32
    %cst_17 = arith.constant 9.99999997E-7 : f32
    %79 = arith.mulf %cst_16, %cst_17 : f32
    %80 = vector.broadcast %79 : f32 to vector<1x128xf32>
    %81 = arith.maximumf %78, %80 : vector<1x128xf32>
    %82 = math.rsqrt %81 : vector<1x128xf32>
    %83 = arith.mulf %71, %82 : vector<1x128xf32>
    %c0_18 = arith.constant 0 : index
    %c0_19 = arith.constant 0 : index
    %84 = vector.load %arg4[%c0_18, %c0_19] : memref<1x128xf32, #tpu.memory_space<vmem>>, vector<1x128xf32>
    tpu.vector_store %arg4[%c0_18, %c0_19], %83 {strides = array<i32>} : memref<1x128xf32, #tpu.memory_space<vmem>>, vector<1x128xf32>,
    return
  }
  func.func @transform_0(%arg0: i32) -> (i32, i32, i32) {
    %c0_i32 = arith.constant 0 : i32
    %c0_i32_0 = arith.constant 0 : i32
    %c0_i32_1 = arith.constant 0 : i32
    return %c0_i32, %c0_i32_0, %arg0 : i32, i32, i32
  }
  func.func @transform_1(%arg0: i32) -> (i32, i32) {
    %c0_i32 = arith.constant 0 : i32
    %c0_i32_0 = arith.constant 0 : i32
    %c0_i32_1 = arith.constant 0 : i32
    return %c0_i32, %c0_i32_0 : i32, i32
  }
  func.func @transform_2(%arg0: i32) -> (i32, i32) {
    %c0_i32 = arith.constant 0 : i32
    %c0_i32_0 = arith.constant 0 : i32
    %c0_i32_1 = arith.constant 0 : i32
    return %c0_i32, %c0_i32_0 : i32, i32
  }
  func.func @transform_3(%arg0: i32) -> (i32, i32) {
    %c0_i32 = arith.constant 0 : i32
    %c0_i32_0 = arith.constant 0 : i32
    return %c0_i32, %arg0 : i32, i32
  }
}

</mosaic_0001>

<bundles_post_ra>
// kernel: tpu_custom_call.1
= control target key start
LH: loop header
LB: loop body
LE: loop exit
PB: predicated region body
PF: predicated region fallthrough
CT: control target
= control target key end

     0   :  { %8 = vsyncpa [#allocation3], 0  ;;  %s1290_s0 = inlined_call_operand.vmem [shape: s32[2,8,128], index: 0, kind: input, shape index: {}]   ;;  %s1291_s1 = inlined_call_operand.hbm [shape: f32[16,48], index: 1, kind: input, shape index: {}]   ;;  %s1292_s2 = inlined_call_operand.vmem [shape: f32[16,1], index: 2, kind: input, shape index: {}]   ;;  %s1293_s3 = inlined_call_operand.hbm [shape: f32[1,128], index: 3, kind: output, shape index: {}]  }
   0x1   :  { %9 = vsyncpa [#allocation4], 0  ;;  %s996_s12 = smov [#allocation2]   ;;  %s948_s16 = scalar_lea.hbm %s1291_s1, 256 }
   0x2   :  { %s17_s13 = sshll.u32 %s996_s12, 4  ;;  %p949_p0 = scmp.ne.s32.totalorder %s1291_s1, %s948_s16  ;;  %s18_s13 = int_to_ptr.vmem [resolvable:$true] %s17_s13 }
   0x3   :  { %p952_p1 = scmp.lt.u32.totalorder %s948_s16, %s1291_s1 }
   0x5   :  { %p954_p2 = pnand %p952_p1, %p949_p0 }
   0x7   :  { %957 = shalt.err (!%p954_p2)
}
   0x8   :  { %s958_s21 = scalar_lea.vmem %s18_s13, 256  ;;  %p963_p4 = scmp.lt.s32.totalorder %s18_s13, %s18_s13 }
   0x9   :  { %p959_p3 = scmp.ne.s32.totalorder %s18_s13, %s958_s21  ;;  %p964_p5 = scmp.lt.s32.totalorder %s958_s21, %s958_s21 }
   0xb   :  { %p965_p6 = por %p964_p5, %p963_p4 }
   0xd   :  { %p966_p7 = pnand %p965_p6, %p959_p3 }
   0xf   :  { %969 = shalt.err (!%p966_p7)
}
  0x10   :  { %s997_s22 = smov 128   ;;  %s998_s23 = smov 8  }
  0x11   :  { %23 = dma.hbm_to_vmem [thread:$0]  %s1291_s1, 256, %s18_s13, [#allocation3], %s997_s22, %s997_s22, %s998_s23  }
  0x12   :  { %992 = dma.done.wait [#allocation3], 256  }
  0x13   :  { %993 = vsyncadd [#allocation3], 4294967040  ;;  %v32_v0 = vlaneseq  ;;  %v999_v1 = vmov 0.0   ;;  %v1000_v3 = vmov 0   ;;  %v1049_v9 = vld [vmem:[%s1290_s0 + $0x8] sm:$0xff]  ;;  %v1054_v10 = vld [vmem:[%s1290_s0] sm:$0xff] }
  0x14   :  { %268 = vmatprep.mubr.f32.mxu0 %v999_v1  ;;  %345 = vmatprep.mubr.f32.mxu1 %v999_v1  ;;  %v686_v15 = vld [vmem:[%s1292_s2] sm:$0xff]  ;;  %v1001_v19 = vmov 1.0|1.0   ;;  %v687_v22 = vld [vmem:[%s1292_s2 + $0x8] sm:$0xff]  ;;  %s1002_s2 = smov [#allocation5]  }
  0x15   :  { %v1037_v2 = vshrl.u32 %v32_v0, 7  ;;  %945 = vset.pattern.permute.xlu0 %v1000_v3  ;;  %v1129_v30 = vld [vmem:[#allocation2] sm:$0xff]  ;;  %v1157_v34 = vld [vmem:[#allocation2 + $0x8] sm:$0xff]  ;;  %s740_s5 = sshll.u32 %s1002_s2, 4  ;;  %s741_s5 = int_to_ptr.vmem [resolvable:$true] %s740_s5 }
  0x16   :  { %690 = vperm.xlu0 %945, %v686_v15   ;;  %s970_s6 = scalar_lea.vmem %s741_s5, 16  ;;  %s974_s7 = scalar_lea.vmem %s741_s5, 32 }
  0x17   :  { %v37_v4 = vsub.s32 0, %v1037_v2  ;;  %v57_v5 = vsub.s32 1, %v1037_v2  ;;  %v77_v6 = vsub.s32 2, %v1037_v2  ;;  %v97_v7 = vsub.s32 3, %v1037_v2  ;;  %p971_p8 = scmp.ne.s32.totalorder %s741_s5, %s970_s6  ;;  %p975_p9 = scmp.lt.s32.totalorder %s741_s5, %s741_s5 }
  0x18   :  { %v1044_v8 = vadd.s32 8, %v1037_v2  ;;  %v117_v21 = vsub.s32 4, %v1037_v2  ;;  %v137_v27 = vsub.s32 5, %v1037_v2  ;;  %v157_v35 = vsub.s32 6, %v1037_v2  ;;  %p976_p10 = scmp.lt.s32.totalorder %s974_s7, %s970_s6 }
  0x19   :  { %v42_v11 = vrot.slane %v1049_v9, %v37_v4  ;;  %v62_v12 = vrot.slane %v1049_v9, %v57_v5  ;;  %v38_v13 = vrot.slane %v1054_v10, %v37_v4  ;;  %v58_v14 = vrot.slane %v1054_v10, %v57_v5 }
  0x1a   :  { %v82_v16 = vrot.slane %v1049_v9, %v77_v6  ;;  %v78_v17 = vrot.slane %v1054_v10, %v77_v6  ;;  %v102_v18 = vrot.slane %v1049_v9, %v97_v7  ;;  %v98_v20 = vrot.slane %v1054_v10, %v97_v7  ;;  %695 = vperm.xlu0 %945, %v687_v22   ;;  %p977_p11 = por %p976_p10, %p975_p9 }
  0x1b   :  { %vm44_vm0 = vcmp.eq.s32.totalorder %v42_v11, %v1037_v2  ;;  %vm46_vm1 = vcmp.eq.s32.totalorder %v42_v11, %v1044_v8  ;;  %vm64_vm2 = vcmp.eq.s32.totalorder %v62_v12, %v1037_v2  ;;  %vm66_vm3 = vcmp.eq.s32.totalorder %v62_v12, %v1044_v8 }
  0x1c   :  { %vm866_vm4 = vmpackc.low %vm46_vm1, %vm44_vm0  ;;  %vm43_vm5 = vcmp.eq.s32.totalorder %v38_v13, %v1037_v2  ;;  %vm45_vm6 = vcmp.eq.s32.totalorder %v38_v13, %v1044_v8  ;;  %vm63_vm7 = vcmp.eq.s32.totalorder %v58_v14, %v1037_v2  ;;  %vm65_vm8 = vcmp.eq.s32.totalorder %v58_v14, %v1044_v8  ;;  %p978_p12 = pnand %p977_p11, %p971_p8 }
  0x1d   :  { %867 = vmatprep.subr.msk.bf16.mxu0 %vm866_vm4, %v1001_v19  ;;  %vm870_vm9 = vmpackc.low %vm66_vm3, %vm64_vm2  ;;  %vm84_vm10 = vcmp.eq.s32.totalorder %v82_v16, %v1037_v2  ;;  %vm86_vm11 = vcmp.eq.s32.totalorder %v82_v16, %v1044_v8  ;;  %vm83_vm13 = vcmp.eq.s32.totalorder %v78_v17, %v1037_v2  ;;  %vm85_vm14 = vcmp.eq.s32.totalorder %v78_v17, %v1044_v8 }
  0x1e   :  { %879 = vmatprep.subr.msk.bf16.mxu1 %vm870_vm9, %v1001_v19  ;;  %vm868_vm12 = vmpackc.low %vm45_vm6, %vm43_vm5  ;;  %vm104_vm0 = vcmp.eq.s32.totalorder %v102_v18, %v1037_v2  ;;  %vm106_vm1 = vcmp.eq.s32.totalorder %v102_v18, %v1044_v8  ;;  %vm103_vm5 = vcmp.eq.s32.totalorder %v98_v20, %v1037_v2  ;;  %vm105_vm6 = vcmp.eq.s32.totalorder %v98_v20, %v1044_v8 }
  0x1f   :  { %869 = vmatpush1.bf16.msk.msra.mxu0 %vm868_vm12, %v1001_v19  ;;  %vm872_vm15 = vmpackc.low %vm65_vm8, %vm63_vm7  ;;  %v122_v26 = vrot.slane %v1049_v9, %v117_v21  ;;  %v118_v29 = vrot.slane %v1054_v10, %v117_v21  ;;  %vm197_vm8 = vcmask 392192   ;;  %v142_v31 = vrot.slane %v1049_v9, %v137_v27 }
  0x20   :  { %881 = vmatpush1.bf16.msk.msra.mxu1 %vm872_vm15, %v1001_v19  ;;  %871 = vmatprep.subr.msk.bf16.mxu0 %vm870_vm9, %v1001_v19  ;;  %vm1092_vm2 = vmpackc.low %vm86_vm11, %vm84_vm10  ;;  %v138_v33 = vrot.slane %v1054_v10, %v137_v27  ;;  %v177_v38 = vsub.s32 7, %v1037_v2  ;;  %v162_v39 = vrot.slane %v1049_v9, %v157_v35  ;;  %v158_v41 = vrot.slane %v1054_v10, %v157_v35 }
  0x21   :  { %883 = vmatprep.subr.msk.bf16.mxu1 %vm1092_vm2, %v1001_v19  ;;  %vm1099_vm3 = vmpackc.low %vm85_vm14, %vm83_vm13  ;;  %vm124_vm9 = vcmp.eq.s32.totalorder %v122_v26, %v1037_v2  ;;  %vm126_vm10 = vcmp.eq.s32.totalorder %v122_v26, %v1044_v8  ;;  %vm123_vm12 = vcmp.eq.s32.totalorder %v118_v29, %v1037_v2  ;;  %vm125_vm13 = vcmp.eq.s32.totalorder %v118_v29, %v1044_v8 }
  0x22   :  { %vm1103_vm4 = vmpackc.low %vm106_vm1, %vm104_vm0  ;;  %vm144_vm14 = vcmp.eq.s32.totalorder %v142_v31, %v1037_v2  ;;  %v182_v42 = vrot.slane %v1049_v9, %v177_v38  ;;  %v178_v43 = vrot.slane %v1054_v10, %v177_v38 }
  0x23   :  { %873 = vmatpush1.bf16.msk.msra.mxu0 %vm872_vm15, %v1001_v19  ;;  %vm1121_vm7 = vmpackc.low %vm105_vm6, %vm103_vm5  ;;  %vm146_vm15 = vcmp.eq.s32.totalorder %v142_v31, %v1044_v8  ;;  %vm164_vm5 = vcmp.eq.s32.totalorder %v162_v39, %v1037_v2  ;;  %vm166_vm6 = vcmp.eq.s32.totalorder %v162_v39, %v1044_v8 }
  0x24   :  { %885 = vmatpush1.bf16.msk.msra.mxu1 %vm1099_vm3, %v1001_v19  ;;  %875 = vmatprep.subr.msk.bf16.mxu0 %vm1092_vm2, %v1001_v19  ;;  %vm1145_vm11 = vmpackc.low %vm126_vm10, %vm124_vm9  ;;  %vm165_vm9 = vcmp.eq.s32.totalorder %v158_v41, %v1044_v8 }
  0x25   :  { %887 = vmatprep.subr.msk.bf16.mxu1 %vm1103_vm4, %v1001_v19  ;;  %vm1171_vm0 = vmpackc.low %vm125_vm13, %vm123_vm12  ;;  %vm186_vm12 = vcmp.eq.s32.totalorder %v182_v42, %v1044_v8 }
  0x26   :  { %vm1179_vm1 = vmpackc.low %vm146_vm15, %vm144_vm14  ;;  %vm183_vm15 = vcmp.eq.s32.totalorder %v178_v43, %v1037_v2 }
  0x27   :  { %877 = vmatpush1.bf16.msk.msra.mxu0 %vm1099_vm3, %v1001_v19  ;;  %vm1233_vm10 = vmpackc.low %vm166_vm6, %vm164_vm5 }
  0x28   :  { %889 = vmatpush1.bf16.msk.msra.mxu1 %vm1121_vm7, %v1001_v19  ;;  %891 = vmatprep.subr.msk.bf16.mxu0 %vm1092_vm2, %v1001_v19  ;;  %vm143_vm2 = vcmp.eq.s32.totalorder %v138_v33, %v1037_v2 }
  0x29   :  { %903 = vmatprep.subr.msk.bf16.mxu1 %vm1103_vm4, %v1001_v19 }
  0x2a   :  { %794 = vmatmul.mubr.msk.f32.vlgmr.msra.gmra.mrb[0].mxu0 %vm197_vm8, %v1129_v30 }
  0x2b   :  { %808 = vmatmul.mubr.msk.f32.vlgmr.msra.gmra.mrb[0].mxu1 %vm197_vm8, %v1129_v30  ;;  %893 = vmatpush1.bf16.msk.msra.mxu0 %vm1099_vm3, %v1001_v19  ;;  %vm145_vm3 = vcmp.eq.s32.totalorder %v138_v33, %v1044_v8 }
  0x2c   :  { %905 = vmatpush1.bf16.msk.msra.mxu1 %vm1121_vm7, %v1001_v19  ;;  %895 = vmatprep.subr.msk.bf16.mxu0 %vm1103_vm4, %v1001_v19  ;;  %vm1201_vm4 = vmpackc.low %vm145_vm3, %vm143_vm2 }
  0x2d   :  { %907 = vmatprep.subr.msk.bf16.mxu1 %vm1145_vm11, %v1001_v19  ;;  %274 = vmatprep.mubr.f32.mxu0 %v999_v1 }
  0x2e   :  { %351 = vmatprep.mubr.f32.mxu1 %v999_v1  ;;  %795 = vmatmul.mubr.msk.f32.gmra.mrb[2].mxu0 %vm197_vm8, %v1157_v34 }
  0x2f   :  { %897 = vmatpush1.bf16.msk.msra.mxu0 %vm1121_vm7, %v1001_v19  ;;  %809 = vmatmul.mubr.msk.f32.gmra.mrb[2].mxu1 %vm197_vm8, %v1157_v34  ;;  %vm163_vm7 = vcmp.eq.s32.totalorder %v158_v41, %v1037_v2 }
  0x30   :  { %909 = vmatpush1.bf16.msk.msra.mxu1 %vm1171_vm0, %v1001_v19  ;;  %899 = vmatprep.subr.msk.bf16.mxu0 %vm1145_vm11, %v1001_v19  ;;  %vm924_vm13 = vmpackc.low %vm165_vm9, %vm163_vm7 }
  0x31   :  { %911 = vmatprep.subr.msk.bf16.mxu1 %vm1179_vm1, %v1001_v19  ;;  %426 = vmatprep.mubr.f32.mxu0 %v999_v1 }
  0x32   :  { %507 = vmatprep.mubr.f32.mxu1 %v999_v1 }
  0x33   :  { %901 = vmatpush1.bf16.msk.msra.mxu0 %vm1171_vm0, %v1001_v19 }
  0x34   :  { %913 = vmatpush1.bf16.msk.msra.mxu1 %vm1201_vm4, %v1001_v19  ;;  %915 = vmatprep.subr.msk.bf16.mxu0 %vm1145_vm11, %v1001_v19  ;;  %vm184_vm11 = vcmp.eq.s32.totalorder %v182_v42, %v1037_v2 }
  0x35   :  { %927 = vmatprep.subr.msk.bf16.mxu1 %vm1179_vm1, %v1001_v19  ;;  %vm934_vm14 = vmpackc.low %vm186_vm12, %vm184_vm11 }
  0x36   :  { %822 = vmatmul.mubr.msk.f32.vlgmr.msra.gmra.mrb[4].mxu0 %vm197_vm8, %v1129_v30 }
  0x37   :  { %917 = vmatpush1.bf16.msk.msra.mxu0 %vm1171_vm0, %v1001_v19  ;;  %836 = vmatmul.mubr.msk.f32.vlgmr.msra.gmra.mrb[4].mxu1 %vm197_vm8, %v1129_v30  ;;  %vm185_vm0 = vcmp.eq.s32.totalorder %v178_v43, %v1044_v8 }
  0x38   :  { %929 = vmatpush1.bf16.msk.msra.mxu1 %vm1201_vm4, %v1001_v19  ;;  %432 = vmatprep.mubr.f32.mxu0 %v999_v1 }
  0x39   :  { %919 = vmatprep.subr.msk.bf16.mxu0 %vm1179_vm1, %v1001_v19  ;;  %513 = vmatprep.mubr.f32.mxu1 %v999_v1  ;;  %vm936_vm1 = vmpackc.low %vm185_vm0, %vm183_vm15 }
  0x3a   :  { %823 = vmatmul.mubr.msk.f32.gmra.mrb[6].mxu0 %vm197_vm8, %v1157_v34  ;;  %931 = vmatprep.subr.msk.bf16.mxu1 %vm1233_vm10, %v1001_v19 }
  0x3b   :  { %921 = vmatpush1.bf16.msk.msra.mxu0 %vm1201_vm4, %v1001_v19  ;;  %837 = vmatmul.mubr.msk.f32.gmra.mrb[6].mxu1 %vm197_vm8, %v1157_v34 }
  0x3c   :  { %933 = vmatpush1.bf16.msk.msra.mxu1 %vm924_vm13, %v1001_v19  ;;  %923 = vmatprep.subr.msk.bf16.mxu0 %vm1233_vm10, %v1001_v19 }
  0x3d   :  { %935 = vmatprep.subr.msk.bf16.mxu1 %vm934_vm14, %v1001_v19  ;;  %588 = vmatprep.mubr.f32.mxu0 %v999_v1 }
  0x3e   :  { %669 = vmatprep.mubr.f32.mxu1 %v999_v1 }
  0x3f   :  { %925 = vmatpush1.bf16.msk.msra.mxu0 %vm924_vm13, %v1001_v19 }
  0x40   :  { %937 = vmatpush1.bf16.msk.msra.mxu1 %vm936_vm1, %v1001_v19 }
  0x42   :  { %850 = vmatmul.mubr.msk.f32.vlgmr.msra.gmra.mrb[8].mxu0 %vm197_vm8, %v1129_v30 }
  0x43   :  { %864 = vmatmul.mubr.msk.f32.vlgmr.msra.gmra.mrb[8].mxu1 %vm197_vm8, %v1129_v30  ;;  %594 = vmatprep.mubr.f32.mxu0 %v999_v1 }
  0x44   :  { %675 = vmatprep.mubr.f32.mxu1 %v999_v1 }
  0x46   :  { %851 = vmatmul.mubr.msk.f32.gmra.mrb[10].mxu0 %vm197_vm8, %v1157_v34 }
  0x47   :  { %865 = vmatmul.mubr.msk.f32.gmra.mrb[10].mxu1 %vm197_vm8, %v1157_v34 }
  0x95   :  { %v691_v13 = vpop.permute.xlu0 %690 }
  0x99   :  { %v696_v28 = vpop.permute.xlu0 %695 }
  0xfd   :  { %v270_v45 = vpop.f32.mrb[0].mxu0 }
  0xfe   :  { %v347_v46 = vpop.f32.mrb[0].mxu1  ;;  %v272_v47 = vpop.f32.mrb[1].mxu0 }
  0xff   :  { %v358_v48 = vmax.f32 %v270_v45, %v347_v46  ;;  %v349_v49 = vpop.f32.mrb[1].mxu1 }
 0x100   :  { %v359_v50 = vmax.f32 %v272_v47, %v349_v49 }
 0x101   :  { %v276_v51 = vpop.f32.mrb[2].mxu0 }
 0x102   :  { %v353_v52 = vpop.f32.mrb[2].mxu1  ;;  %v278_v53 = vpop.f32.mrb[3].mxu0 }
 0x103   :  { %v360_v54 = vmax.f32 %v276_v51, %v353_v52  ;;  %v355_v55 = vpop.f32.mrb[3].mxu1 }
 0x104   :  { %v361_v56 = vmax.f32 %v278_v53, %v355_v55 }
 0x109   :  { %v428_v57 = vpop.f32.mrb[4].mxu0 }
 0x10a   :  { %v439_v58 = vmax.f32 %v358_v48, %v428_v57  ;;  %v430_v59 = vpop.f32.mrb[5].mxu0  ;;  %v509_v60 = vpop.f32.mrb[4].mxu1 }
 0x10b   :  { %v440_v61 = vmax.f32 %v359_v50, %v430_v59  ;;  %v511_v62 = vpop.f32.mrb[5].mxu1 }
 0x10c   :  { %v520_v63 = vmax.f32 %v439_v58, %v509_v60 }
 0x10d   :  { %v521_v0 = vmax.f32 %v440_v61, %v511_v62  ;;  %v434_v1 = vpop.f32.mrb[6].mxu0 }
 0x10e   :  { %v441_v2 = vmax.f32 %v360_v54, %v434_v1  ;;  %v436_v3 = vpop.f32.mrb[7].mxu0  ;;  %v515_v4 = vpop.f32.mrb[6].mxu1 }
 0x10f   :  { %v442_v5 = vmax.f32 %v361_v56, %v436_v3  ;;  %v517_v6 = vpop.f32.mrb[7].mxu1 }
 0x110   :  { %v522_v7 = vmax.f32 %v441_v2, %v515_v4 }
 0x111   :  { %v523_v8 = vmax.f32 %v442_v5, %v517_v6 }
 0x115   :  { %v590_v9 = vpop.f32.mrb[8].mxu0 }
 0x116   :  { %v601_v10 = vmax.f32 %v520_v63, %v590_v9  ;;  %v592_v11 = vpop.f32.mrb[9].mxu0  ;;  %v671_v12 = vpop.f32.mrb[8].mxu1 }
 0x117   :  { %v602_v14 = vmax.f32 %v521_v0, %v592_v11  ;;  %v673_v15 = vpop.f32.mrb[9].mxu1 }
 0x118   :  { %v682_v16 = vmax.f32 %v601_v10, %v671_v12 }
 0x119   :  { %v683_v17 = vmax.f32 %v602_v14, %v673_v15  ;;  %v596_v18 = vpop.f32.mrb[10].mxu0 }
 0x11a   :  { %v698_v19 = vadd.f32 %v691_v13, %v682_v16  ;;  %v603_v20 = vmax.f32 %v522_v7, %v596_v18  ;;  %v598_v21 = vpop.f32.mrb[11].mxu0  ;;  %v677_v22 = vpop.f32.mrb[10].mxu1 }
 0x11b   :  { %v699_v23 = vadd.f32 %v691_v13, %v683_v17  ;;  %v604_v24 = vmax.f32 %v523_v8, %v598_v21  ;;  %v679_v25 = vpop.f32.mrb[11].mxu1 }
 0x11c   :  { %v684_v26 = vmax.f32 %v603_v20, %v677_v22  ;;  %v711_v32 = vmul.f32 %v698_v19, %v698_v19 }
 0x11d   :  { %v702_v27 = vmul.f32 %v699_v23, %v698_v19  ;;  %v685_v29 = vmax.f32 %v604_v24, %v679_v25  ;;  %v720_v34 = vmul.f32 %v699_v23, %v699_v23 }
 0x11e   :  { %v700_v30 = vadd.f32 %v696_v28, %v684_v26 }
 0x11f   :  { %v701_v31 = vadd.f32 %v696_v28, %v685_v29 }
 0x120   :  { %v712_v33 = vmul.f32 %v700_v30, %v700_v30 }
 0x121   :  { %v703_v35 = vmul.f32 %v701_v31, %v700_v30  ;;  %v721_v36 = vmul.f32 %v701_v31, %v701_v31 }
 0x122   :  { %v713_v37 = vadd.f32 %v712_v33, %v711_v32 }
 0x123   :  { %v704_v38 = vadd.f32 %v703_v35, %v702_v27  ;;  %v722_v39 = vadd.f32 %v721_v36, %v720_v34 }
 0x124   :  { %v714_v40 = vrot.slane %v713_v37, 4 }
 0x125   :  { %v723_v41 = vrot.slane %v722_v39, 4  ;;  %v705_v47 = vrot.slane %v704_v38, 4 }
 0x126   :  { %v715_v42 = vadd.f32 %v714_v40, %v713_v37 }
 0x127   :  { %v724_v43 = vadd.f32 %v723_v41, %v722_v39  ;;  %v706_v52 = vadd.f32 %v705_v47, %v704_v38 }
 0x128   :  { %v716_v44 = vrot.slane %v715_v42, 2 }
 0x129   :  { %v725_v45 = vrot.slane %v724_v43, 2  ;;  %v707_v55 = vrot.slane %v706_v52, 2 }
 0x12a   :  { %v717_v46 = vadd.f32 %v716_v44, %v715_v42 }
 0x12b   :  { %v726_v48 = vadd.f32 %v725_v45, %v724_v43  ;;  %v708_v57 = vadd.f32 %v707_v55, %v706_v52 }
 0x12c   :  { %v718_v49 = vrot.slane %v717_v46, 1 }
 0x12d   :  { %v727_v50 = vrot.slane %v726_v48, 1  ;;  %v709_v58 = vrot.slane %v708_v57, 1 }
 0x12e   :  { %v719_v51 = vadd.f32 %v718_v49, %v717_v46 }
 0x12f   :  { %v728_v53 = vadd.f32 %v727_v50, %v726_v48  ;;  %v710_v59 = vadd.f32 %v709_v58, %v708_v57 }
 0x131   :  { %v729_v54 = vmul.f32 %v728_v53, %v719_v51 }
 0x133   :  { %v730_v56 = vmax.f32 %v729_v54, 1e-12 }
 0x135   :  { %946 = vrsqrt.f32 %v730_v56 }
 0x13f   :  { %v947_v60 = vpop.eup %946 }
 0x140   :  { %v732_v61 = vmul.f32 %v947_v60, %v710_v59 }
 0x142   :  { %733 = vst [vmem:[#allocation5] sm:$0x1] %v732_v61 }
 0x143   :  { %981 = shalt.err (!%p978_p12)
}
 0x144   :  { %s982_s10 = scalar_lea.hbm %s1293_s3, 16 }
 0x145   :  { %p983_p13 = scmp.ne.s32.totalorder %s1293_s3, %s982_s10  ;;  %p986_p0 = scmp.lt.u32.totalorder %s982_s10, %s1293_s3 }
 0x147   :  { %p988_p1 = pnand %p986_p0, %p983_p13 }
 0x149   :  { %991 = shalt.err (!%p988_p1)
}
 0x14a   :  { %743 = dma.vmem_to_hbm [thread:$0]  %s741_s5, 16, %s1293_s3, [#allocation4]  }
 0x14b   :  { %994 = dma.done.wait [#allocation4], 16  }
 0x14c   :  { %995 = vsyncadd [#allocation4], 4294967280 }
 0x14d   :  { %747 = vsyncpa [#allocation3], 1 }
 0x14e   :  { %748 = vsyncpa [#allocation4], 1 }

</bundles_post_ra>
